<compile_context>
chip_gen: v5e
topology: v5e:2x2
jax: 0.10.0
libtpu: 0.0.40
codegen_flags: <defaults>
</compile_context>

<pallas_src>
import functools

import jax
import jax.numpy as jnp
from jax.experimental import pallas as pl
from jax.experimental.pallas import tpu as pltpu


def _activation_fn(name):
    if name is None:
        return lambda x: x
    name = name.lower()
    if name == "relu":
        return lambda x: jnp.maximum(x, 0.0)
    if name == "elu":
        return lambda x: jnp.where(x > 0, x, jnp.expm1(x))
    if name == "silu":
        return lambda x: x * jax.nn.sigmoid(x)
    raise ValueError(f"unknown activation {name!r}")


def _residual_block_kernel(x_ref, w_ref, o_ref, *, n_layers, activation):
    # x_ref: (tm, units)  w_ref: (n_layers, units, units)  o_ref: (tm, units)
    act = _activation_fn(activation)
    # Feed the MXU in the storage dtype (bf16 x bf16 -> f32 is the native path);
    # activation / residual math is done in f32 (the accumulator dtype).
    h = x_ref[...]
    for l in range(n_layers):  # static unroll; n_layers is small & compile-time known
        z = jnp.dot(h.astype(w_ref.dtype), w_ref[l],
                    preferred_element_type=jnp.float32)
        h = act(z)  # f32
    # Re-read the residual from the already-resident VMEM input block (cheap vld)
    # instead of keeping the x tile live across the whole unrolled layer loop.
    o_ref[...] = (x_ref[...].astype(jnp.float32) + h).astype(o_ref.dtype)


# Minimum sublane count for the second-to-last block dim, by element size.
_SUBLANE_MIN = {4: 8, 2: 16, 1: 32}


def _choose_tm(N, units, weight_bytes, x_itemsize, budget_bytes):
    """Pick the biggest row tile that fits the VMEM budget (single step if possible)."""

    def fits(tm):
        io_bytes = 2 * 2 * tm * units * x_itemsize   # double-buffered in + out tiles
        work_bytes = 4 * tm * units * 4              # f32 working-set headroom
        return weight_bytes + io_bytes + work_bytes <= budget_bytes

    if fits(N):
        return N                                     # one grid step over the whole batch
    sub = _SUBLANE_MIN.get(x_itemsize, 8)
    for tm in (1024, 768, 512, 384, 256, 128, 64, 32, 16, 8):
        if tm >= sub and N % tm == 0 and fits(tm):
            return tm
    return N                                         # degenerate fallback


def _build_call(kernel, N, units, n_layers, tm, x_dtype, x_itemsize,
                w_itemsize, single_buffer_weights):
    weight_bytes = n_layers * units * units * w_itemsize
    weight_bufs = 1 if single_buffer_weights else 2
    vmem_bytes = (weight_bufs * weight_bytes
                  + 2 * 2 * tm * units * x_itemsize
                  + 4 * tm * units * 4)
    # Explicit scoped-VMEM limit sized to weights + in/out tiles + f32 working set,
    # kept under the 64 MiB/TC floor of v7x.
    vmem_limit = int(min(max(int(vmem_bytes * 1.25) + (2 << 20), 16 << 20), 48 << 20))

    w_spec_kwargs = {}
    if single_buffer_weights:
        # Constant index_map -> the weight slab never changes; one buffer is enough.
        w_spec_kwargs["pipeline_mode"] = pl.Buffered(1)
    w_spec = pl.BlockSpec((n_layers, units, units), lambda i: (0, 0, 0),
                          **w_spec_kwargs)

    return pl.pallas_call(
        kernel,
        out_shape=jax.ShapeDtypeStruct((N, units), x_dtype),
        grid_spec=pltpu.PrefetchScalarGridSpec(
            num_scalar_prefetch=0,
            grid=(N // tm,),
            in_specs=[
                pl.BlockSpec((tm, units), lambda i: (i, 0)),
                w_spec,
            ],
            out_specs=pl.BlockSpec((tm, units), lambda i: (i, 0)),
        ),
        compiler_params=pltpu.CompilerParams(
            dimension_semantics=("parallel",),
            vmem_limit_bytes=vmem_limit),
    )


def residual_block(x, weights, *, activation=None, tm=None):
    """x: (N, units) f32 or bf16.  weights: (n_layers, units, units) with weights[l] == W_l.T."""
    N, units = x.shape
    n_layers = weights.shape[0]

    weight_bytes = int(weights.size) * weights.dtype.itemsize
    if tm is None:
        tm = _choose_tm(N, units, weight_bytes, x.dtype.itemsize,
                        budget_bytes=40 << 20)
    assert N % tm == 0, "batch must be a multiple of the row tile"

    kernel = functools.partial(
        _residual_block_kernel, n_layers=n_layers, activation=activation)

    try:
        call = _build_call(kernel, N, units, n_layers, tm, x.dtype,
                           x.dtype.itemsize, weights.dtype.itemsize,
                           single_buffer_weights=True)
        return call(x, weights)
    except Exception:
        # Fallback if this JAX version rejects single-buffered (Buffered(1)) pipelining.
        call = _build_call(kernel, N, units, n_layers, tm, x.dtype,
                           x.dtype.itemsize, weights.dtype.itemsize,
                           single_buffer_weights=False)
        return call(x, weights)


def he_kaiming_init_weight(key, units):
    """Deterministic stand-in for the module's he_kaiming_init.

    In the PyTorch code only the in-place orthogonal_() actually mutates the parameter
    (the standardization creates a new tensor that is discarded), so the effective Linear
    weight is an orthogonal (units, units) matrix. Reproduced via QR with sign fix.
    """
    a = jax.random.normal(key, (units, units), dtype=jnp.float32)
    q, r = jnp.linalg.qr(a)
    q = q * jnp.sign(jnp.diagonal(r))[None, :]
    return q  # W_l (out, in); orthogonal, so W_l.T is too


def make_params(key, units, n_layers, dtype=jnp.float32):
    keys = jax.random.split(key, n_layers)
    ws = [he_kaiming_init_weight(k, units) for k in keys]
    # store pre-transposed: w[l] = W_l.T so the kernel does h @ w[l]
    return jnp.stack([w.T for w in ws], axis=0).astype(dtype)


def residual_block_ref(x, weights, activation=None):
    act = _activation_fn(activation)
    h = x.astype(jnp.float32)
    for l in range(weights.shape[0]):
        z = jnp.dot(h.astype(weights.dtype), weights[l],
                    preferred_element_type=jnp.float32)
        h = act(z)
    return (x.astype(jnp.float32) + h).astype(x.dtype)


if __name__ == "__main__":
    key = jax.random.PRNGKey(0)
    kx, kw, kx2, kw2 = jax.random.split(key, 4)

    # --- small f32 case matching the module spec (units=32, n_layers=3) ---
    units, n_layers, batch, activation = 32, 3, 16, "relu"
    x = jax.random.normal(kx, (batch, units), dtype=jnp.float32)
    w = make_params(kw, units, n_layers)
    out = jax.block_until_ready(residual_block(x, w, activation=activation))
    ref = residual_block_ref(x, w, activation=activation)
    assert out.shape == (batch, units)
    assert jnp.allclose(out, ref, atol=1e-5, rtol=1e-5), "f32 mismatch vs reference"

    # --- bf16 case: native MXU path (bf16 x bf16 -> f32 accumulate) ---
    units2, n_layers2, batch2 = 128, 2, 64
    x2 = jax.random.normal(kx2, (batch2, units2), dtype=jnp.float32).astype(jnp.bfloat16)
    w2 = make_params(kw2, units2, n_layers2, dtype=jnp.bfloat16)
    out2 = jax.block_until_ready(residual_block(x2, w2, activation="silu"))
    ref2 = residual_block_ref(x2, w2, activation="silu")
    assert out2.shape == (batch2, units2)
    assert jnp.allclose(out2.astype(jnp.float32), ref2.astype(jnp.float32),
                        atol=2e-2, rtol=2e-2), "bf16 mismatch vs reference"

    print("KERNEL_OK")
</pallas_src>

<mosaic_0001>
module attributes {stable_mosaic.version = 11 : i64} {
  func.func @_residual_block_kernel(%arg0: i32, %arg1: memref<16x32xf32, #tpu.memory_space<vmem>>, %arg2: memref<3x32x32xf32, #tpu.memory_space<vmem>>, %arg3: memref<16x32xf32, #tpu.memory_space<vmem>>) attributes {dimension_semantics = [#tpu.dimension_semantics<parallel>], iteration_bounds = array<i64: 1>, scalar_prefetch = 0 : i64, scratch_operands = 0 : i64, tpu.core_type = #tpu.core_type<tc>, window_params = [{transform_indices = @transform_0, window_bounds = array<i64: 16, 32>}, {pipeline_mode = #tpu.pipeline_mode<synchronous>, transform_indices = @transform_1, window_bounds = array<i64: 3, 32, 32>}, {transform_indices = @transform_2, window_bounds = array<i64: 16, 32>}]} {
    %c0 = arith.constant 0 : index
    %c0_0 = arith.constant 0 : index
    %0 = vector.load %arg1[%c0, %c0_0] : memref<16x32xf32, #tpu.memory_space<vmem>>, vector<16x32xf32>
    %c0_1 = arith.constant 0 : index
    %c0_2 = arith.constant 0 : index
    %c0_3 = arith.constant 0 : index
    %1 = vector.load %arg2[%c0_1, %c0_2, %c0_3] : memref<3x32x32xf32, #tpu.memory_space<vmem>>, vector<1x32x32xf32>
    %2 = vector.shape_cast %1 : vector<1x32x32xf32> to vector<32x32xf32>
    %cst = arith.constant dense<0.000000e+00> : vector<16x32xf32>
    %3 = tpu.matmul %0, %2, %cst {dimension_numbers = #tpu.dot_dimension_numbers<[1], [0], [0], [1], [0, 0, 1, 1], [], []>} : vector<16x32xf32>, vector<32x32xf32>, vector<16x32xf32> -> vector<16x32xf32>
    %cst_4 = arith.constant 0.000000e+00 : f32
    %4 = vector.broadcast %cst_4 : f32 to vector<16x32xf32>
    %5 = arith.maximumf %3, %4 : vector<16x32xf32>
    %c1 = arith.constant 1 : index
    %c0_5 = arith.constant 0 : index
    %c0_6 = arith.constant 0 : index
    %6 = vector.load %arg2[%c1, %c0_5, %c0_6] : memref<3x32x32xf32, #tpu.memory_space<vmem>>, vector<1x32x32xf32>
    %7 = vector.shape_cast %6 : vector<1x32x32xf32> to vector<32x32xf32>
    %cst_7 = arith.constant dense<0.000000e+00> : vector<16x32xf32>
    %8 = tpu.matmul %5, %7, %cst_7 {dimension_numbers = #tpu.dot_dimension_numbers<[1], [0], [0], [1], [0, 0, 1, 1], [], []>} : vector<16x32xf32>, vector<32x32xf32>, vector<16x32xf32> -> vector<16x32xf32>
    %cst_8 = arith.constant 0.000000e+00 : f32
    %9 = vector.broadcast %cst_8 : f32 to vector<16x32xf32>
    %10 = arith.maximumf %8, %9 : vector<16x32xf32>
    %c2 = arith.constant 2 : index
    %c0_9 = arith.constant 0 : index
    %c0_10 = arith.constant 0 : index
    %11 = vector.load %arg2[%c2, %c0_9, %c0_10] : memref<3x32x32xf32, #tpu.memory_space<vmem>>, vector<1x32x32xf32>
    %12 = vector.shape_cast %11 : vector<1x32x32xf32> to vector<32x32xf32>
    %cst_11 = arith.constant dense<0.000000e+00> : vector<16x32xf32>
    %13 = tpu.matmul %10, %12, %cst_11 {dimension_numbers = #tpu.dot_dimension_numbers<[1], [0], [0], [1], [0, 0, 1, 1], [], []>} : vector<16x32xf32>, vector<32x32xf32>, vector<16x32xf32> -> vector<16x32xf32>
    %cst_12 = arith.constant 0.000000e+00 : f32
    %14 = vector.broadcast %cst_12 : f32 to vector<16x32xf32>
    %15 = arith.maximumf %13, %14 : vector<16x32xf32>
    %c0_13 = arith.constant 0 : index
    %c0_14 = arith.constant 0 : index
    %16 = vector.load %arg1[%c0_13, %c0_14] : memref<16x32xf32, #tpu.memory_space<vmem>>, vector<16x32xf32>
    %17 = arith.addf %16, %15 : vector<16x32xf32>
    %c0_15 = arith.constant 0 : index
    %c0_16 = arith.constant 0 : index
    %18 = vector.load %arg3[%c0_15, %c0_16] : memref<16x32xf32, #tpu.memory_space<vmem>>, vector<16x32xf32>
    tpu.vector_store %arg3[%c0_15, %c0_16], %17 {strides = array<i32>} : memref<16x32xf32, #tpu.memory_space<vmem>>, vector<16x32xf32>,
    return
  }
  func.func @transform_0(%arg0: i32) -> (i32, i32) {
    %c0_i32 = arith.constant 0 : i32
    %c0_i32_0 = arith.constant 0 : i32
    return %arg0, %c0_i32 : i32, i32
  }
  func.func @transform_1(%arg0: i32) -> (i32, i32, i32) {
    %c0_i32 = arith.constant 0 : i32
    %c0_i32_0 = arith.constant 0 : i32
    %c0_i32_1 = arith.constant 0 : i32
    %c0_i32_2 = arith.constant 0 : i32
    return %c0_i32, %c0_i32_0, %c0_i32_1 : i32, i32, i32
  }
  func.func @transform_2(%arg0: i32) -> (i32, i32) {
    %c0_i32 = arith.constant 0 : i32
    %c0_i32_0 = arith.constant 0 : i32
    return %arg0, %c0_i32 : i32, i32
  }
}

module attributes {stable_mosaic.version = 11 : i64} {
  func.func @_residual_block_kernel(%arg0: i32, %arg1: memref<16x32xf32, #tpu.memory_space<vmem>>, %arg2: memref<3x32x32xf32, #tpu.memory_space<vmem>>, %arg3: memref<16x32xf32, #tpu.memory_space<vmem>>) attributes {dimension_semantics = [#tpu.dimension_semantics<parallel>], iteration_bounds = array<i64: 1>, scalar_prefetch = 0 : i64, scratch_operands = 0 : i64, tpu.core_type = #tpu.core_type<tc>, window_params = [{transform_indices = @transform_0, window_bounds = array<i64: 16, 32>}, {pipeline_mode = #tpu.pipeline_mode<synchronous>, transform_indices = @transform_1, window_bounds = array<i64: 3, 32, 32>}, {transform_indices = @transform_2, window_bounds = array<i64: 16, 32>}]} {
    %c0 = arith.constant 0 : index
    %c0_0 = arith.constant 0 : index
    %0 = vector.load %arg1[%c0, %c0_0] : memref<16x32xf32, #tpu.memory_space<vmem>>, vector<16x32xf32>
    %c0_1 = arith.constant 0 : index
    %c0_2 = arith.constant 0 : index
    %c0_3 = arith.constant 0 : index
    %1 = vector.load %arg2[%c0_1, %c0_2, %c0_3] : memref<3x32x32xf32, #tpu.memory_space<vmem>>, vector<1x32x32xf32>
    %2 = vector.shape_cast %1 : vector<1x32x32xf32> to vector<32x32xf32>
    %cst = arith.constant dense<0.000000e+00> : vector<16x32xf32>
    %3 = tpu.matmul %0, %2, %cst {dimension_numbers = #tpu.dot_dimension_numbers<[1], [0], [0], [1], [0, 0, 1, 1], [], []>} : vector<16x32xf32>, vector<32x32xf32>, vector<16x32xf32> -> vector<16x32xf32>
    %cst_4 = arith.constant 0.000000e+00 : f32
    %4 = vector.broadcast %cst_4 : f32 to vector<16x32xf32>
    %5 = arith.maximumf %3, %4 : vector<16x32xf32>
    %c1 = arith.constant 1 : index
    %c0_5 = arith.constant 0 : index
    %c0_6 = arith.constant 0 : index
    %6 = vector.load %arg2[%c1, %c0_5, %c0_6] : memref<3x32x32xf32, #tpu.memory_space<vmem>>, vector<1x32x32xf32>
    %7 = vector.shape_cast %6 : vector<1x32x32xf32> to vector<32x32xf32>
    %cst_7 = arith.constant dense<0.000000e+00> : vector<16x32xf32>
    %8 = tpu.matmul %5, %7, %cst_7 {dimension_numbers = #tpu.dot_dimension_numbers<[1], [0], [0], [1], [0, 0, 1, 1], [], []>} : vector<16x32xf32>, vector<32x32xf32>, vector<16x32xf32> -> vector<16x32xf32>
    %cst_8 = arith.constant 0.000000e+00 : f32
    %9 = vector.broadcast %cst_8 : f32 to vector<16x32xf32>
    %10 = arith.maximumf %8, %9 : vector<16x32xf32>
    %c2 = arith.constant 2 : index
    %c0_9 = arith.constant 0 : index
    %c0_10 = arith.constant 0 : index
    %11 = vector.load %arg2[%c2, %c0_9, %c0_10] : memref<3x32x32xf32, #tpu.memory_space<vmem>>, vector<1x32x32xf32>
    %12 = vector.shape_cast %11 : vector<1x32x32xf32> to vector<32x32xf32>
    %cst_11 = arith.constant dense<0.000000e+00> : vector<16x32xf32>
    %13 = tpu.matmul %10, %12, %cst_11 {dimension_numbers = #tpu.dot_dimension_numbers<[1], [0], [0], [1], [0, 0, 1, 1], [], []>} : vector<16x32xf32>, vector<32x32xf32>, vector<16x32xf32> -> vector<16x32xf32>
    %cst_12 = arith.constant 0.000000e+00 : f32
    %14 = vector.broadcast %cst_12 : f32 to vector<16x32xf32>
    %15 = arith.maximumf %13, %14 : vector<16x32xf32>
    %c0_13 = arith.constant 0 : index
    %c0_14 = arith.constant 0 : index
    %16 = vector.load %arg1[%c0_13, %c0_14] : memref<16x32xf32, #tpu.memory_space<vmem>>, vector<16x32xf32>
    %17 = arith.addf %16, %15 : vector<16x32xf32>
    %c0_15 = arith.constant 0 : index
    %c0_16 = arith.constant 0 : index
    %18 = vector.load %arg3[%c0_15, %c0_16] : memref<16x32xf32, #tpu.memory_space<vmem>>, vector<16x32xf32>
    tpu.vector_store %arg3[%c0_15, %c0_16], %17 {strides = array<i32>} : memref<16x32xf32, #tpu.memory_space<vmem>>, vector<16x32xf32>,
    return
  }
  func.func @transform_0(%arg0: i32) -> (i32, i32) {
    %c0_i32 = arith.constant 0 : i32
    %c0_i32_0 = arith.constant 0 : i32
    return %arg0, %c0_i32 : i32, i32
  }
  func.func @transform_1(%arg0: i32) -> (i32, i32, i32) {
    %c0_i32 = arith.constant 0 : i32
    %c0_i32_0 = arith.constant 0 : i32
    %c0_i32_1 = arith.constant 0 : i32
    %c0_i32_2 = arith.constant 0 : i32
    return %c0_i32, %c0_i32_0, %c0_i32_1 : i32, i32, i32
  }
  func.func @transform_2(%arg0: i32) -> (i32, i32) {
    %c0_i32 = arith.constant 0 : i32
    %c0_i32_0 = arith.constant 0 : i32
    return %arg0, %c0_i32 : i32, i32
  }
}

</mosaic_0001>

<bundles_post_ra>
// kernel: tpu_custom_call.1
= control target key start
LH: loop header
LB: loop body
LE: loop exit
PB: predicated region body
PF: predicated region fallthrough
CT: control target
= control target key end

     0   :  { %7 = vsyncpa [#allocation3], 0  ;;  %s317_s0 = inlined_call_operand.hbm [shape: f32[16,32], index: 0, kind: input, shape index: {}]   ;;  %s318_s1 = inlined_call_operand.hbm [shape: f32[3,32,32], index: 1, kind: input, shape index: {}]   ;;  %s319_s2 = inlined_call_operand.hbm [shape: f32[16,32], index: 2, kind: output, shape index: {}]  }
   0x1   :  { %8 = vsyncpa [#allocation6], 0 }
   0x2   :  { %9 = vsyncpa [#allocation4], 0  ;;  %s14_s11 = sshll.u32 %s317_s0, 4  ;;  %s271_s12 = smov [#allocation2]   ;;  %s15_s11 = int_to_ptr.hbm [resolvable:$true] %s14_s11 }
   0x3   :  { %s16_s13 = sshll.u32 %s271_s12, 4  ;;  %s27_s16 = sshll.u32 %s318_s1, 4  ;;  %s17_s13 = int_to_ptr.vmem [resolvable:$true] %s16_s13  ;;  %s28_s16 = int_to_ptr.hbm [resolvable:$true] %s27_s16 }
   0x4   :  { %s272_s17 = smov 128   ;;  %s273_s18 = smov 8  }
   0x5   :  { %22 = dma.hbm_to_vmem [thread:$0]  %s15_s11, 256, %s17_s13, [#allocation3], %s272_s17, %s272_s17, %s273_s18  }
   0x6   :  { %s274_s19 = smov [#allocation5]  }
   0x7   :  { %s29_s20 = sshll.u32 %s274_s19, 4  ;;  %s30_s20 = int_to_ptr.vmem [resolvable:$true] %s29_s20 }
   0x8   :  { %35 = dma.hbm_to_vmem [thread:$0]  %s28_s16, 1536, %s30_s20, [#allocation6], %s272_s17, %s272_s17, %s273_s18  }
   0x9   :  { %265 = dma.done.wait [#allocation3], 256  }
   0xa   :  { %266 = vsyncadd [#allocation3], 4294967040 }
   0xb   :  { %267 = dma.done.wait [#allocation6], 1536  }
   0xc   :  { %268 = vsyncadd [#allocation6], 4294965760  ;;  %v49_v0 = vld [vmem:[#allocation5 + $0x18] sm:$0xff]  ;;  %v48_v1 = vld [vmem:[#allocation5 + $0x10] sm:$0xff]  ;;  %vm50_vm0 = vcmask 261120   ;;  %s275_s0 = smov [#allocation7]  }
   0xd   :  { %69 = vmatpush.msra.mxu0 %v49_v0  ;;  %184 = vmatpush.msra.mxu3 %v49_v0  ;;  %v47_v2 = vld [vmem:[#allocation5 + $0x8] sm:$0xff]  ;;  %v86_v3 = vld [vmem:[#allocation5 + $0x38] sm:$0xff]  ;;  %v85_v4 = vld [vmem:[#allocation5 + $0x30] sm:$0xff]  ;;  %s162_s1 = sshll.u32 %s275_s0, 4  ;;  %s164_s23 = sshll.u32 %s319_s2, 4  ;;  %s163_s1 = int_to_ptr.vmem [resolvable:$true] %s162_s1  ;;  %s165_s23 = int_to_ptr.hbm [resolvable:$true] %s164_s23 }
   0xe   :  { %v46_v5 = vld [vmem:[#allocation5] sm:$0xff]  ;;  %105 = vmatpush.msra.mxu1 %v86_v3  ;;  %v44_v6 = vld [vmem:[#allocation2] sm:$0xff]  ;;  %v45_v7 = vld [vmem:[#allocation2 + $0x8] sm:$0xff] }
   0xf   :  { %70 = vmatpush.msra.mxu0 %v48_v1  ;;  %185 = vmatpush.msra.mxu3 %v48_v1  ;;  %v84_v8 = vld [vmem:[#allocation5 + $0x28] sm:$0xff]  ;;  %v83_v9 = vld [vmem:[#allocation5 + $0x20] sm:$0xff]  ;;  %v122_v10 = vld [vmem:[#allocation5 + $0x58] sm:$0xff] }
  0x10   :  { %106 = vmatpush.msra.mxu1 %v85_v4  ;;  %v121_v11 = vld [vmem:[#allocation5 + $0x50] sm:$0xff]  ;;  %141 = vmatpush.msra.mxu2 %v122_v10  ;;  %v120_v16 = vld [vmem:[#allocation5 + $0x48] sm:$0xff]  ;;  %v119_v17 = vld [vmem:[#allocation5 + $0x40] sm:$0xff] }
  0x11   :  { %71 = vmatpush.msra.mxu0 %v47_v2  ;;  %186 = vmatpush.msra.mxu3 %v47_v2 }
  0x12   :  { %107 = vmatpush.msra.mxu1 %v84_v8  ;;  %142 = vmatpush.msra.mxu2 %v121_v11 }
  0x13   :  { %72 = vmatpush.msra.mxu0 %v46_v5  ;;  %187 = vmatpush.msra.mxu3 %v46_v5 }
  0x14   :  { %178 = vmatmul.msk.f32.vlgmr.msra.gmra.mxu0 %vm50_vm0, %v44_v6  ;;  %179 = vmatmul.msk.f32.vlgmr.msra.gmra.mxu3 %vm50_vm0, %v45_v7 }
  0x15   :  { %108 = vmatpush.msra.mxu1 %v83_v9  ;;  %143 = vmatpush.msra.mxu2 %v120_v16 }
  0x17   :  { %144 = vmatpush.msra.mxu2 %v119_v17 }
  0x91   :  { %v74_v12 = vpop.f32.mrf.mxu0 }
  0x92   :  { %v80_v13 = vmax.f32 %v74_v12, 0.0 }
  0x94   :  { %180 = vmatmul.msk.f32.vlgmr.msra.gmra.mxu1 %vm50_vm0, %v80_v13 }
  0x97   :  { %v77_v14 = vpop.f32.mrf.mxu3 }
  0x98   :  { %v81_v15 = vmax.f32 %v77_v14, 0.0 }
  0x9c   :  { %181 = vmatmul.msk.f32.gmra.mxu1 %vm50_vm0, %v81_v15 }
 0x111   :  { %v110_v18 = vpop.f32.mrf.mxu1 }
 0x112   :  { %v116_v19 = vmax.f32 %v110_v18, 0.0 }
 0x114   :  { %182 = vmatmul.msk.f32.vlgmr.msra.gmra.mxu2 %vm50_vm0, %v116_v19 }
 0x119   :  { %v113_v20 = vpop.f32.mrf.mxu1 }
 0x11a   :  { %v117_v21 = vmax.f32 %v113_v20, 0.0 }
 0x11c   :  { %183 = vmatmul.msk.f32.gmra.mxu2 %vm50_vm0, %v117_v21 }
 0x197   :  { %v146_v22 = vpop.f32.mrf.mxu2 }
 0x198   :  { %v152_v23 = vmax.f32 %v146_v22, 0.0 }
 0x19a   :  { %v154_v24 = vadd.f32 %v152_v23, %v44_v6 }
 0x19c   :  { %156 = vst.msk [vmem:[#allocation7] sm:$0xff] %vm50_vm0, %v154_v24 }
 0x19f   :  { %v149_v25 = vpop.f32.mrf.mxu2 }
 0x1a0   :  { %v153_v26 = vmax.f32 %v149_v25, 0.0 }
 0x1a2   :  { %v155_v27 = vadd.f32 %v153_v26, %v45_v7 }
 0x1a4   :  { %157 = vst.msk [vmem:[#allocation7 + $0x8] sm:$0xff] %vm50_vm0, %v155_v27 }
 0x1a5   :  { %170 = dma.vmem_to_hbm [thread:$0]  %s163_s1, 256, %s165_s23, [#allocation4], %s272_s17, %s272_s17, %s273_s18  }
 0x1a6   :  { %269 = dma.done.wait [#allocation4], 256  }
 0x1a7   :  { %270 = vsyncadd [#allocation4], 4294967040 }
 0x1a8   :  { %175 = vsyncpa [#allocation3], 1 }
 0x1a9   :  { %176 = vsyncpa [#allocation6], 1 }
 0x1aa   :  { %177 = vsyncpa [#allocation4], 1 }

// kernel: tpu_custom_call.1
= control target key start
LH: loop header
LB: loop body
LE: loop exit
PB: predicated region body
PF: predicated region fallthrough
CT: control target
= control target key end

     0   :  { %7 = vsyncpa [#allocation3], 0  ;;  %s317_s0 = inlined_call_operand.hbm [shape: f32[16,32], index: 0, kind: input, shape index: {}]   ;;  %s318_s1 = inlined_call_operand.hbm [shape: f32[3,32,32], index: 1, kind: input, shape index: {}]   ;;  %s319_s2 = inlined_call_operand.hbm [shape: f32[16,32], index: 2, kind: output, shape index: {}]  }
   0x1   :  { %8 = vsyncpa [#allocation6], 0 }
   0x2   :  { %9 = vsyncpa [#allocation4], 0  ;;  %s14_s11 = sshll.u32 %s317_s0, 4  ;;  %s271_s12 = smov [#allocation2]   ;;  %s15_s11 = int_to_ptr.hbm [resolvable:$true] %s14_s11 }
   0x3   :  { %s16_s13 = sshll.u32 %s271_s12, 4  ;;  %s27_s16 = sshll.u32 %s318_s1, 4  ;;  %s17_s13 = int_to_ptr.vmem [resolvable:$true] %s16_s13  ;;  %s28_s16 = int_to_ptr.hbm [resolvable:$true] %s27_s16 }
   0x4   :  { %s272_s17 = smov 128   ;;  %s273_s18 = smov 8  }
   0x5   :  { %22 = dma.hbm_to_vmem [thread:$0]  %s15_s11, 256, %s17_s13, [#allocation3], %s272_s17, %s272_s17, %s273_s18  }
   0x6   :  { %s274_s19 = smov [#allocation5]  }
   0x7   :  { %s29_s20 = sshll.u32 %s274_s19, 4  ;;  %s30_s20 = int_to_ptr.vmem [resolvable:$true] %s29_s20 }
   0x8   :  { %35 = dma.hbm_to_vmem [thread:$0]  %s28_s16, 1536, %s30_s20, [#allocation6], %s272_s17, %s272_s17, %s273_s18  }
   0x9   :  { %265 = dma.done.wait [#allocation3], 256  }
   0xa   :  { %266 = vsyncadd [#allocation3], 4294967040 }
   0xb   :  { %267 = dma.done.wait [#allocation6], 1536  }
   0xc   :  { %268 = vsyncadd [#allocation6], 4294965760  ;;  %v49_v0 = vld [vmem:[#allocation5 + $0x18] sm:$0xff]  ;;  %v48_v1 = vld [vmem:[#allocation5 + $0x10] sm:$0xff]  ;;  %vm50_vm0 = vcmask 261120   ;;  %s275_s0 = smov [#allocation7]  }
   0xd   :  { %69 = vmatpush.msra.mxu0 %v49_v0  ;;  %184 = vmatpush.msra.mxu3 %v49_v0  ;;  %v47_v2 = vld [vmem:[#allocation5 + $0x8] sm:$0xff]  ;;  %v86_v3 = vld [vmem:[#allocation5 + $0x38] sm:$0xff]  ;;  %v85_v4 = vld [vmem:[#allocation5 + $0x30] sm:$0xff]  ;;  %s162_s1 = sshll.u32 %s275_s0, 4  ;;  %s164_s23 = sshll.u32 %s319_s2, 4  ;;  %s163_s1 = int_to_ptr.vmem [resolvable:$true] %s162_s1  ;;  %s165_s23 = int_to_ptr.hbm [resolvable:$true] %s164_s23 }
   0xe   :  { %v46_v5 = vld [vmem:[#allocation5] sm:$0xff]  ;;  %105 = vmatpush.msra.mxu1 %v86_v3  ;;  %v44_v6 = vld [vmem:[#allocation2] sm:$0xff]  ;;  %v45_v7 = vld [vmem:[#allocation2 + $0x8] sm:$0xff] }
   0xf   :  { %70 = vmatpush.msra.mxu0 %v48_v1  ;;  %185 = vmatpush.msra.mxu3 %v48_v1  ;;  %v84_v8 = vld [vmem:[#allocation5 + $0x28] sm:$0xff]  ;;  %v83_v9 = vld [vmem:[#allocation5 + $0x20] sm:$0xff]  ;;  %v122_v10 = vld [vmem:[#allocation5 + $0x58] sm:$0xff] }
  0x10   :  { %106 = vmatpush.msra.mxu1 %v85_v4  ;;  %v121_v11 = vld [vmem:[#allocation5 + $0x50] sm:$0xff]  ;;  %141 = vmatpush.msra.mxu2 %v122_v10  ;;  %v120_v16 = vld [vmem:[#allocation5 + $0x48] sm:$0xff]  ;;  %v119_v17 = vld [vmem:[#allocation5 + $0x40] sm:$0xff] }
  0x11   :  { %71 = vmatpush.msra.mxu0 %v47_v2  ;;  %186 = vmatpush.msra.mxu3 %v47_v2 }
  0x12   :  { %107 = vmatpush.msra.mxu1 %v84_v8  ;;  %142 = vmatpush.msra.mxu2 %v121_v11 }
  0x13   :  { %72 = vmatpush.msra.mxu0 %v46_v5  ;;  %187 = vmatpush.msra.mxu3 %v46_v5 }
  0x14   :  { %178 = vmatmul.msk.f32.vlgmr.msra.gmra.mxu0 %vm50_vm0, %v44_v6  ;;  %179 = vmatmul.msk.f32.vlgmr.msra.gmra.mxu3 %vm50_vm0, %v45_v7 }
  0x15   :  { %108 = vmatpush.msra.mxu1 %v83_v9  ;;  %143 = vmatpush.msra.mxu2 %v120_v16 }
  0x17   :  { %144 = vmatpush.msra.mxu2 %v119_v17 }
  0x91   :  { %v74_v12 = vpop.f32.mrf.mxu0 }
  0x92   :  { %v80_v13 = vmax.f32 %v74_v12, 0.0 }
  0x94   :  { %180 = vmatmul.msk.f32.vlgmr.msra.gmra.mxu1 %vm50_vm0, %v80_v13 }
  0x97   :  { %v77_v14 = vpop.f32.mrf.mxu3 }
  0x98   :  { %v81_v15 = vmax.f32 %v77_v14, 0.0 }
  0x9c   :  { %181 = vmatmul.msk.f32.gmra.mxu1 %vm50_vm0, %v81_v15 }
 0x111   :  { %v110_v18 = vpop.f32.mrf.mxu1 }
 0x112   :  { %v116_v19 = vmax.f32 %v110_v18, 0.0 }
 0x114   :  { %182 = vmatmul.msk.f32.vlgmr.msra.gmra.mxu2 %vm50_vm0, %v116_v19 }
 0x119   :  { %v113_v20 = vpop.f32.mrf.mxu1 }
 0x11a   :  { %v117_v21 = vmax.f32 %v113_v20, 0.0 }
 0x11c   :  { %183 = vmatmul.msk.f32.gmra.mxu2 %vm50_vm0, %v117_v21 }
 0x197   :  { %v146_v22 = vpop.f32.mrf.mxu2 }
 0x198   :  { %v152_v23 = vmax.f32 %v146_v22, 0.0 }
 0x19a   :  { %v154_v24 = vadd.f32 %v152_v23, %v44_v6 }
 0x19c   :  { %156 = vst.msk [vmem:[#allocation7] sm:$0xff] %vm50_vm0, %v154_v24 }
 0x19f   :  { %v149_v25 = vpop.f32.mrf.mxu2 }
 0x1a0   :  { %v153_v26 = vmax.f32 %v149_v25, 0.0 }
 0x1a2   :  { %v155_v27 = vadd.f32 %v153_v26, %v45_v7 }
 0x1a4   :  { %157 = vst.msk [vmem:[#allocation7 + $0x8] sm:$0xff] %vm50_vm0, %v155_v27 }
 0x1a5   :  { %170 = dma.vmem_to_hbm [thread:$0]  %s163_s1, 256, %s165_s23, [#allocation4], %s272_s17, %s272_s17, %s273_s18  }
 0x1a6   :  { %269 = dma.done.wait [#allocation4], 256  }
 0x1a7   :  { %270 = vsyncadd [#allocation4], 4294967040 }
 0x1a8   :  { %175 = vsyncpa [#allocation3], 1 }
 0x1a9   :  { %176 = vsyncpa [#allocation6], 1 }
 0x1aa   :  { %177 = vsyncpa [#allocation4], 1 }

</bundles_post_ra>
